<compile_context>
chip_gen: v6e
topology: v6e:2x2x1
jax: 0.10.0
libtpu: 0.0.40
codegen_flags: <defaults>
</compile_context>

<pallas_src>
import jax
import jax.numpy as jnp
from jax.experimental import pallas as pl
from jax.experimental.pallas import tpu as pltpu


_VMEM_LIMIT_BYTES = 32 * 1024 * 1024   # > v5e 16MiB default, <= v7x 64MiB physical
_MAX_BATCH_TILE = 512                  # (8,128)-aligned, fits v7x VMEM budget


# ---------------------------------------------------------------------------
# Kernels
# ---------------------------------------------------------------------------

def _mlp(x_bf16, w1, w2, w3, w4, b):
    """Fused 4-layer MLP.  bf16 dot inputs, f32 MXU accumulation, f32 output."""
    h = jnp.dot(x_bf16, w1, preferred_element_type=jnp.float32) + b[0:1, : w1.shape[1]]
    h = jnp.maximum(h, 0.0).astype(jnp.bfloat16)          # ReLU (Dropout == identity)
    h = jnp.dot(h, w2, preferred_element_type=jnp.float32) + b[1:2, : w2.shape[1]]
    h = jnp.maximum(h, 0.0).astype(jnp.bfloat16)
    h = jnp.dot(h, w3, preferred_element_type=jnp.float32) + b[2:3, : w3.shape[1]]
    h = jnp.maximum(h, 0.0).astype(jnp.bfloat16)
    return jnp.dot(h, w4, preferred_element_type=jnp.float32) + b[3:4, : w4.shape[1]]


def _reward_kernel(x_ref, w1_ref, w2_ref, w3_ref, w4_ref, b_ref, out_ref):
    """reward = MLP(state) for one batch tile."""
    out_ref[...] = _mlp(
        x_ref[...], w1_ref[...], w2_ref[...], w3_ref[...], w4_ref[...], b_ref[...]
    ).astype(out_ref.dtype)


def _preference_kernel(xp_ref, xr_ref, w1_ref, w2_ref, w3_ref, w4_ref, b_ref, out_ref):
    """sigmoid(r(preferred) - r(rejected)) for one batch tile, weights loaded once."""
    w1, w2, w3, w4 = w1_ref[...], w2_ref[...], w3_ref[...], w4_ref[...]
    b = b_ref[...]
    r_pref = _mlp(xp_ref[...], w1, w2, w3, w4, b)   # (tile_b, 1) f32
    r_rej = _mlp(xr_ref[...], w1, w2, w3, w4, b)    # (tile_b, 1) f32
    out_ref[...] = jax.nn.sigmoid(r_pref - r_rej).astype(out_ref.dtype)


# ---------------------------------------------------------------------------
# Wrappers
# ---------------------------------------------------------------------------

def _round_up(x, m):
    return ((x + m - 1) // m) * m


def _batch_tile(batch):
    return min(_MAX_BATCH_TILE, _round_up(max(batch, 1), 8))


def _pad_rows(x, rows):
    pad = rows - x.shape[0]
    if pad:
        x = jnp.pad(x, ((0, pad), (0, 0)))
    return x


def _weight_specs(params):
    const = lambda i: (0, 0)
    return [
        pl.BlockSpec(params["w1"].shape, const),
        pl.BlockSpec(params["w2"].shape, const),
        pl.BlockSpec(params["w3"].shape, const),
        pl.BlockSpec(params["w4"].shape, const),
        pl.BlockSpec(params["biases"].shape, const),
    ]


def _compiler_params():
    return pltpu.CompilerParams(
        dimension_semantics=("parallel",),
        vmem_limit_bytes=_VMEM_LIMIT_BYTES,
    )


@jax.jit
def reward_model_forward(state, params):
    """state: [B, state_dim] -> reward: [B, 1] float32."""
    batch, state_dim = state.shape
    tile_b = _batch_tile(batch)
    padded = _round_up(batch, tile_b)
    x = _pad_rows(state.astype(jnp.bfloat16), padded)

    row_map = lambda i: (i, 0)
    out = pl.pallas_call(
        _reward_kernel,
        out_shape=jax.ShapeDtypeStruct((padded, 1), jnp.float32),
        grid=(padded // tile_b,),
        in_specs=[pl.BlockSpec((tile_b, state_dim), row_map)] + _weight_specs(params),
        out_specs=pl.BlockSpec((tile_b, 1), row_map),
        compiler_params=_compiler_params(),
    )(x, params["w1"], params["w2"], params["w3"], params["w4"], params["biases"])
    return out[:batch]


@jax.jit
def predict_preference(preferred_state, rejected_state, params):
    """sigmoid(r(preferred) - r(rejected)), fused into ONE pallas_call."""
    batch, state_dim = preferred_state.shape
    tile_b = _batch_tile(batch)
    padded = _round_up(batch, tile_b)
    xp = _pad_rows(preferred_state.astype(jnp.bfloat16), padded)
    xr = _pad_rows(rejected_state.astype(jnp.bfloat16), padded)

    row_map = lambda i: (i, 0)
    out = pl.pallas_call(
        _preference_kernel,
        out_shape=jax.ShapeDtypeStruct((padded, 1), jnp.float32),
        grid=(padded // tile_b,),
        in_specs=[
            pl.BlockSpec((tile_b, state_dim), row_map),
            pl.BlockSpec((tile_b, state_dim), row_map),
        ] + _weight_specs(params),
        out_specs=pl.BlockSpec((tile_b, 1), row_map),
        compiler_params=_compiler_params(),
    )(xp, xr, params["w1"], params["w2"], params["w3"], params["w4"], params["biases"])
    return out[:batch]


# ---------------------------------------------------------------------------
# Parameter init (matches the PyTorch module: xavier_uniform weights, zero bias)
# ---------------------------------------------------------------------------

def _xavier_uniform(key, fan_in, fan_out):
    bound = jnp.sqrt(6.0 / (fan_in + fan_out))
    return jax.random.uniform(key, (fan_in, fan_out), jnp.float32, -bound, bound)


def init_reward_model_params(key, state_dim, hidden_dims=(128, 64, 32)):
    dims = [state_dim, *hidden_dims, 1]
    keys = jax.random.split(key, len(dims) - 1)
    params = {}
    for i, (fi, fo) in enumerate(zip(dims[:-1], dims[1:]), start=1):
        # stored as [in, out] bf16 so the kernel computes x @ W (== PyTorch x @ W.T)
        params[f"w{i}"] = _xavier_uniform(keys[i - 1], fi, fo).astype(jnp.bfloat16)
    # all 4 biases packed into ONE lane-padded f32 tensor (fewer tiny DMAs);
    # zero-initialized, matching torch.nn.init.zeros_.
    bias_width = max(128, max(dims[1:]))
    params["biases"] = jnp.zeros((len(dims) - 1, bias_width), jnp.float32)
    return params


# ---------------------------------------------------------------------------
# Pure-JAX f32 reference
# ---------------------------------------------------------------------------

def _reference_forward(state, params):
    h = state.astype(jnp.float32)
    for i in range(1, 4):
        w = params[f"w{i}"].astype(jnp.float32)
        b = params["biases"][i - 1, : w.shape[1]]
        h = jnp.maximum(h @ w + b, 0.0)
    w4 = params["w4"].astype(jnp.float32)
    return h @ w4 + params["biases"][3, : w4.shape[1]]


if __name__ == "__main__":
    key = jax.random.PRNGKey(0)
    k_param, k_x1, k_x2 = jax.random.split(key, 3)

    batch, state_dim = 8, 32
    params = init_reward_model_params(k_param, state_dim)

    preferred = jax.random.normal(k_x1, (batch, state_dim), jnp.float32)
    rejected = jax.random.normal(k_x2, (batch, state_dim), jnp.float32)

    # forward pass
    reward = reward_model_forward(preferred, params)
    jax.block_until_ready(reward)
    assert reward.shape == (batch, 1)

    ref = _reference_forward(preferred, params)
    # bf16 weights/activations vs f32 reference -> loose tolerance
    assert jnp.allclose(reward, ref, atol=5e-2, rtol=5e-2), (
        float(jnp.max(jnp.abs(reward - ref))))

    # preference path (single fused pallas_call, in-kernel sigmoid)
    prob = predict_preference(preferred, rejected, params)
    jax.block_until_ready(prob)
    assert prob.shape == (batch, 1)
    assert bool(jnp.all((prob >= 0.0) & (prob <= 1.0)))

    prob_ref = jax.nn.sigmoid(_reference_forward(preferred, params)
                              - _reference_forward(rejected, params))
    assert jnp.allclose(prob, prob_ref, atol=5e-2, rtol=5e-2), (
        float(jnp.max(jnp.abs(prob - prob_ref))))

    print("KERNEL_OK")
</pallas_src>

<mosaic_0001>
module attributes {stable_mosaic.version = 11 : i64} {
  func.func @_reward_kernel(%arg0: i32, %arg1: memref<8x32xbf16, #tpu.memory_space<vmem>>, %arg2: memref<32x128xbf16, #tpu.memory_space<vmem>>, %arg3: memref<128x64xbf16, #tpu.memory_space<vmem>>, %arg4: memref<64x32xbf16, #tpu.memory_space<vmem>>, %arg5: memref<32x1xbf16, #tpu.memory_space<vmem>>, %arg6: memref<4x128xf32, #tpu.memory_space<vmem>>, %arg7: memref<8x1xf32, #tpu.memory_space<vmem>>) attributes {dimension_semantics = [#tpu.dimension_semantics<parallel>], iteration_bounds = array<i64: 1>, scalar_prefetch = 0 : i64, scratch_operands = 0 : i64, tpu.core_type = #tpu.core_type<tc>, window_params = [{transform_indices = @transform_0, window_bounds = array<i64: 8, 32>}, {pipeline_mode = #tpu.pipeline_mode<synchronous>, transform_indices = @transform_1, window_bounds = array<i64: 32, 128>}, {pipeline_mode = #tpu.pipeline_mode<synchronous>, transform_indices = @transform_2, window_bounds = array<i64: 128, 64>}, {pipeline_mode = #tpu.pipeline_mode<synchronous>, transform_indices = @transform_3, window_bounds = array<i64: 64, 32>}, {pipeline_mode = #tpu.pipeline_mode<synchronous>, transform_indices = @transform_4, window_bounds = array<i64: 32, 1>}, {pipeline_mode = #tpu.pipeline_mode<synchronous>, transform_indices = @transform_5, window_bounds = array<i64: 4, 128>}, {transform_indices = @transform_6, window_bounds = array<i64: 8, 1>}]} {
    %c0 = arith.constant 0 : index
    %c0_0 = arith.constant 0 : index
    %0 = vector.load %arg1[%c0, %c0_0] : memref<8x32xbf16, #tpu.memory_space<vmem>>, vector<8x32xbf16>
    %c0_1 = arith.constant 0 : index
    %c0_2 = arith.constant 0 : index
    %1 = vector.load %arg2[%c0_1, %c0_2] : memref<32x128xbf16, #tpu.memory_space<vmem>>, vector<32x128xbf16>
    %c0_3 = arith.constant 0 : index
    %c0_4 = arith.constant 0 : index
    %2 = vector.load %arg3[%c0_3, %c0_4] : memref<128x64xbf16, #tpu.memory_space<vmem>>, vector<128x64xbf16>
    %c0_5 = arith.constant 0 : index
    %c0_6 = arith.constant 0 : index
    %3 = vector.load %arg4[%c0_5, %c0_6] : memref<64x32xbf16, #tpu.memory_space<vmem>>, vector<64x32xbf16>
    %c0_7 = arith.constant 0 : index
    %c0_8 = arith.constant 0 : index
    %4 = vector.load %arg5[%c0_7, %c0_8] : memref<32x1xbf16, #tpu.memory_space<vmem>>, vector<32x1xbf16>
    %c0_9 = arith.constant 0 : index
    %c0_10 = arith.constant 0 : index
    %5 = vector.load %arg6[%c0_9, %c0_10] : memref<4x128xf32, #tpu.memory_space<vmem>>, vector<4x128xf32>
    %cst = arith.constant dense<0.000000e+00> : vector<8x128xf32>
    %6 = tpu.matmul %0, %1, %cst {dimension_numbers = #tpu.dot_dimension_numbers<[1], [0], [0], [1], [0, 0, 1, 1], [], []>} : vector<8x32xbf16>, vector<32x128xbf16>, vector<8x128xf32> -> vector<8x128xf32>
    %7 = vector.extract_strided_slice %5 {offsets = [0, 0], sizes = [1, 128], strides = [1, 1]} : vector<4x128xf32> to vector<1x128xf32>
    %8 = vector.broadcast %7 : vector<1x128xf32> to vector<8x128xf32>
    %9 = arith.addf %6, %8 : vector<8x128xf32>
    %cst_11 = arith.constant 0.000000e+00 : f32
    %10 = vector.broadcast %cst_11 : f32 to vector<8x128xf32>
    %11 = arith.maximumf %9, %10 : vector<8x128xf32>
    %12 = arith.truncf %11 : vector<8x128xf32> to vector<8x128xbf16>
    %cst_12 = arith.constant dense<0.000000e+00> : vector<8x64xf32>
    %13 = tpu.matmul %12, %2, %cst_12 {dimension_numbers = #tpu.dot_dimension_numbers<[1], [0], [0], [1], [0, 0, 1, 1], [], []>} : vector<8x128xbf16>, vector<128x64xbf16>, vector<8x64xf32> -> vector<8x64xf32>
    %14 = vector.extract_strided_slice %5 {offsets = [1, 0], sizes = [1, 64], strides = [1, 1]} : vector<4x128xf32> to vector<1x64xf32>
    %15 = vector.broadcast %14 : vector<1x64xf32> to vector<8x64xf32>
    %16 = arith.addf %13, %15 : vector<8x64xf32>
    %cst_13 = arith.constant 0.000000e+00 : f32
    %17 = vector.broadcast %cst_13 : f32 to vector<8x64xf32>
    %18 = arith.maximumf %16, %17 : vector<8x64xf32>
    %19 = arith.truncf %18 : vector<8x64xf32> to vector<8x64xbf16>
    %cst_14 = arith.constant dense<0.000000e+00> : vector<8x32xf32>
    %20 = tpu.matmul %19, %3, %cst_14 {dimension_numbers = #tpu.dot_dimension_numbers<[1], [0], [0], [1], [0, 0, 1, 1], [], []>} : vector<8x64xbf16>, vector<64x32xbf16>, vector<8x32xf32> -> vector<8x32xf32>
    %21 = vector.extract_strided_slice %5 {offsets = [2, 0], sizes = [1, 32], strides = [1, 1]} : vector<4x128xf32> to vector<1x32xf32>
    %22 = vector.broadcast %21 : vector<1x32xf32> to vector<8x32xf32>
    %23 = arith.addf %20, %22 : vector<8x32xf32>
    %cst_15 = arith.constant 0.000000e+00 : f32
    %24 = vector.broadcast %cst_15 : f32 to vector<8x32xf32>
    %25 = arith.maximumf %23, %24 : vector<8x32xf32>
    %26 = arith.truncf %25 : vector<8x32xf32> to vector<8x32xbf16>
    %cst_16 = arith.constant dense<0.000000e+00> : vector<8x1xf32>
    %27 = tpu.matmul %26, %4, %cst_16 {dimension_numbers = #tpu.dot_dimension_numbers<[1], [0], [0], [1], [0, 0, 1, 1], [], []>} : vector<8x32xbf16>, vector<32x1xbf16>, vector<8x1xf32> -> vector<8x1xf32>
    %28 = vector.extract_strided_slice %5 {offsets = [3, 0], sizes = [1, 1], strides = [1, 1]} : vector<4x128xf32> to vector<1x1xf32>
    %29 = vector.broadcast %28 : vector<1x1xf32> to vector<8x1xf32>
    %30 = arith.addf %27, %29 : vector<8x1xf32>
    %c0_17 = arith.constant 0 : index
    %c0_18 = arith.constant 0 : index
    %31 = vector.load %arg7[%c0_17, %c0_18] : memref<8x1xf32, #tpu.memory_space<vmem>>, vector<8x1xf32>
    tpu.vector_store %arg7[%c0_17, %c0_18], %30 {strides = array<i32>} : memref<8x1xf32, #tpu.memory_space<vmem>>, vector<8x1xf32>,
    return
  }
  func.func @transform_0(%arg0: i32) -> (i32, i32) {
    %c0_i32 = arith.constant 0 : i32
    %c0_i32_0 = arith.constant 0 : i32
    return %arg0, %c0_i32 : i32, i32
  }
  func.func @transform_1(%arg0: i32) -> (i32, i32) {
    %c0_i32 = arith.constant 0 : i32
    %c0_i32_0 = arith.constant 0 : i32
    %c0_i32_1 = arith.constant 0 : i32
    return %c0_i32, %c0_i32_0 : i32, i32
  }
  func.func @transform_2(%arg0: i32) -> (i32, i32) {
    %c0_i32 = arith.constant 0 : i32
    %c0_i32_0 = arith.constant 0 : i32
    %c0_i32_1 = arith.constant 0 : i32
    return %c0_i32, %c0_i32_0 : i32, i32
  }
  func.func @transform_3(%arg0: i32) -> (i32, i32) {
    %c0_i32 = arith.constant 0 : i32
    %c0_i32_0 = arith.constant 0 : i32
    %c0_i32_1 = arith.constant 0 : i32
    return %c0_i32, %c0_i32_0 : i32, i32
  }
  func.func @transform_4(%arg0: i32) -> (i32, i32) {
    %c0_i32 = arith.constant 0 : i32
    %c0_i32_0 = arith.constant 0 : i32
    %c0_i32_1 = arith.constant 0 : i32
    return %c0_i32, %c0_i32_0 : i32, i32
  }
  func.func @transform_5(%arg0: i32) -> (i32, i32) {
    %c0_i32 = arith.constant 0 : i32
    %c0_i32_0 = arith.constant 0 : i32
    %c0_i32_1 = arith.constant 0 : i32
    return %c0_i32, %c0_i32_0 : i32, i32
  }
  func.func @transform_6(%arg0: i32) -> (i32, i32) {
    %c0_i32 = arith.constant 0 : i32
    %c0_i32_0 = arith.constant 0 : i32
    return %arg0, %c0_i32 : i32, i32
  }
}

</mosaic_0001>

<bundles_post_ra>
// kernel: reward_model_forward.1
= control target key start
LH: loop header
LB: loop body
LE: loop exit
PB: predicated region body
PF: predicated region fallthrough
CT: control target
= control target key end

     0   :  { %v458_v0 = vmov 0.0   ;;  %vm459_vm0 = vmmov 0   ;;  %vm74_vm1 = vcmask 261120   ;;  %v58_v14 = vlaneseq  ;;  %s578_s1 = inlined_call_operand.vmem [shape: bf16[32,128], index: 1, kind: input, shape index: {}]   ;;  %s579_s2 = inlined_call_operand.vmem [shape: bf16[128,64], index: 2, kind: input, shape index: {}]   ;;  %s580_s0 = inlined_call_operand.vmem [shape: bf16[8,32], index: 0, kind: input, shape index: {}]   ;;  %s581_s3 = inlined_call_operand.vmem [shape: bf16[64,32], index: 3, kind: input, shape index: {}]   ;;  %s582_s5 = inlined_call_operand.vmem [shape: f32[4,128], index: 5, kind: input, shape index: {}]   ;;  %s583_s4 = inlined_call_operand.vmem [shape: bf16[32,1], index: 4, kind: input, shape index: {}]   ;;  %s584_s6 = inlined_call_operand.vmem [shape: f32[8,1], index: 6, kind: output, shape index: {}]  }
   0x1   :  { %392 = vmatprep.subr.bf16.mxu0 %v458_v0  ;;  %v442_v1 = vld [vmem:[%s578_s1 + $0x8] sm:$0xff]   ;;  %396 = vmatprep.mubr.msk.bf16.mxu0 %vm459_vm0, %v458_v0  ;;  %v443_v2 = vld [vmem:[%s578_s1] sm:$0xff]   ;;  %v444_v3 = vld [vmem:[%s579_s2 + $0x38] sm:$0xff]   ;;  %vm242_vm2 = vcmask 523264   ;;  %vm347_vm3 = vcmask 7168  }
   0x2   :  { %400 = vmatprep.subr.bf16.mxu1 %v458_v0  ;;  %416 = vmatprep.mubr.msk.bf16.mxu1 %vm459_vm0, %v458_v0  ;;  %v445_v4 = vld [vmem:[%s579_s2 + $0x30] sm:$0xff]   ;;  %v24_v5 = vld [vmem:[%s580_s0] sm:$0xf]  ;;  %v446_v6 = vld [vmem:[%s579_s2 + $0x28] sm:$0xff]   ;;  %v59_v15 = vshrl.u32 %v58_v14, 7 }
   0x3   :  { %393 = vmatpush3.bf16.msra.mxu0 %v442_v1  ;;  %401 = vmatpush3.bf16.msra.mxu1 %v444_v3  ;;  %v447_v7 = vld [vmem:[%s579_s2 + $0x20] sm:$0xff]   ;;  %v448_v8 = vld [vmem:[%s579_s2 + $0x18] sm:$0xff]   ;;  %v449_v9 = vld [vmem:[%s579_s2 + $0x10] sm:$0xff]  }
   0x4   :  { %394 = vmatprep.subr.bf16.mxu0 %v458_v0  ;;  %402 = vmatprep.subr.bf16.mxu1 %v458_v0  ;;  %v450_v10 = vld [vmem:[%s579_s2 + $0x8] sm:$0xff]   ;;  %v451_v11 = vld [vmem:[%s579_s2] sm:$0xff]   ;;  %v452_v12 = vld [vmem:[%s581_s3 + $0x18] sm:$0xff]   ;;  %v60_v16 = vsub.s32 0, %v59_v15  ;;  %v122_v28 = vsub.s32 1, %v59_v15  ;;  %v216_v39 = vsub.s32 2, %v59_v15 }
   0x5   :  { %v453_v13 = vld [vmem:[%s581_s3 + $0x10] sm:$0xff]   ;;  %v57_v17 = vld [vmem:[%s582_s5] sm:$0xf]  ;;  %v454_v26 = vld [vmem:[%s581_s3 + $0x8] sm:$0xff]   ;;  %v290_v48 = vsub.s32 3, %v59_v15 }
   0x6   :  { %v61_v18 = vrot.slane %v57_v17, %v60_v16  ;;  %v455_v27 = vld [vmem:[%s581_s3] sm:$0xff]   ;;  %v123_v29 = vrot.slane %v57_v17, %v122_v28  ;;  %v456_v35 = vld [vmem:[%s583_s4 + $0x8] sm:$0xff]   ;;  %v217_v40 = vrot.slane %v57_v17, %v216_v39 }
   0x7   :  { %395 = vmatpush3.bf16.msra.mxu0 %v443_v2  ;;  %403 = vmatpush3.bf16.msra.mxu1 %v445_v4  ;;  %v457_v38 = vld [vmem:[%s583_s4] sm:$0xff]   ;;  %v291_v49 = vrot.slane %v57_v17, %v290_v48 }
   0x8   :  { %420 = vmatprep.subr.bf16.mxu0 %v458_v0  ;;  %404 = vmatprep.subr.bf16.mxu1 %v458_v0 }
   0xa   :  { %397 = vmatmul.mubr.msk.bf16.vlgmr.msra.gmra.mxu0 %vm74_vm1, %v24_v5 }
   0xb   :  { %428 = vmatprep.mubr.msk.bf16.mxu0 %vm459_vm0, %v458_v0  ;;  %405 = vmatpush3.bf16.msra.mxu1 %v446_v6 }
   0xc   :  { %406 = vmatprep.subr.bf16.mxu1 %v458_v0  ;;  %421 = vmatpush3.bf16.msra.mxu0 %v452_v12 }
   0xd   :  { %422 = vmatprep.subr.bf16.mxu0 %v458_v0 }
   0xf   :  { %407 = vmatpush3.bf16.msra.mxu1 %v447_v7 }
  0x10   :  { %408 = vmatprep.subr.bf16.mxu1 %v458_v0  ;;  %423 = vmatpush3.bf16.msra.mxu0 %v453_v13 }
  0x11   :  { %424 = vmatprep.subr.bf16.mxu0 %v458_v0 }
  0x13   :  { %409 = vmatpush3.bf16.msra.mxu1 %v448_v8 }
  0x14   :  { %410 = vmatprep.subr.bf16.mxu1 %v458_v0  ;;  %425 = vmatpush3.bf16.msra.mxu0 %v454_v26 }
  0x15   :  { %426 = vmatprep.subr.bf16.mxu0 %v458_v0 }
  0x17   :  { %411 = vmatpush3.bf16.msra.mxu1 %v449_v9 }
  0x18   :  { %412 = vmatprep.subr.bf16.mxu1 %v458_v0  ;;  %427 = vmatpush3.bf16.msra.mxu0 %v455_v27 }
  0x19   :  { %432 = vmatprep.subr.bf16.mxu0 %v458_v0 }
  0x1b   :  { %413 = vmatpush3.bf16.msra.mxu1 %v450_v10 }
  0x1c   :  { %414 = vmatprep.subr.bf16.mxu1 %v458_v0 }
  0x1f   :  { %415 = vmatpush3.bf16.msra.mxu1 %v451_v11 }
  0xca   :  { %v112_v19 = vpop.f32.mrf.mxu0 }
  0xcb   :  { %v113_v20 = vadd.f32 %v112_v19, %v61_v18 }
  0xcc   :  { %v398_v21 = vpop.f32.mrf.mxu0 }
  0xcd   :  { %v118_v22 = vmax.f32 %v113_v20, 0.0 }
  0xce   :  { %v115_v23 = vpop.f32.mrf.mxu0 }
  0xcf   :  { %v119_v24 = vpack.c.bf16 %v118_v22, %v118_v22 }
  0xd0   :  { %v399_v25 = vpop.f32.mrf.mxu0 }
  0xd1   :  { %417 = vmatmul.mubr.bf16.vlgmr.msra.gmra.mxu1 %v119_v24 }
 0x191   :  { %v206_v30 = vpop.f32.mrf.mxu1 }
 0x192   :  { %v207_v31 = vadd.f32 %v206_v30, %v123_v29 }
 0x193   :  { %v418_v32 = vpop.f32.mrf.mxu1 }
 0x194   :  { %v212_v33 = vmax.f32 %v207_v31, 0.0 }
 0x195   :  { %v209_v34 = vpop.f32.mrf.mxu1 }
 0x196   :  { %v213_v36 = vpack.c.bf16 %v212_v33, %v212_v33 }
 0x197   :  { %v419_v37 = vpop.f32.mrf.mxu1 }
 0x198   :  { %429 = vmatmul.mubr.msk.bf16.vlgmr.msra.gmra.mxu0 %vm242_vm2, %v213_v36 }
 0x199   :  { %433 = vmatpush3.bf16.msra.mxu0 %v456_v35  ;;  %436 = vmatprep.mubr.msk.bf16.mxu0 %vm459_vm0, %v458_v0 }
 0x19a   :  { %434 = vmatprep.subr.bf16.mxu0 %v458_v0 }
 0x19d   :  { %435 = vmatpush3.bf16.msra.mxu0 %v457_v38 }
 0x258   :  { %v280_v41 = vpop.f32.mrf.mxu0 }
 0x259   :  { %v281_v42 = vadd.f32 %v280_v41, %v217_v40 }
 0x25a   :  { %v430_v43 = vpop.f32.mrf.mxu0 }
 0x25b   :  { %v286_v44 = vmax.f32 %v281_v42, 0.0 }
 0x25c   :  { %v283_v45 = vpop.f32.mrf.mxu0 }
 0x25d   :  { %v287_v46 = vpack.c.bf16 %v286_v44, %v286_v44 }
 0x25e   :  { %v431_v47 = vpop.f32.mrf.mxu0 }
 0x25f   :  { %437 = vmatmul.mubr.msk.bf16.vlgmr.msra.gmra.mxu0 %vm74_vm1, %v287_v46 }
 0x31f   :  { %v341_v50 = vpop.f32.mrf.mxu0 }
 0x320   :  { %v342_v51 = vadd.f32 %v341_v50, %v291_v49 }
 0x321   :  { %v438_v52 = vpop.f32.mrf.mxu0 }
 0x322   :  { %348 = vst.msk [vmem:[%s584_s6] sm:$0xff] %vm347_vm3, %v342_v51 }
 0x323   :  { %v344_v53 = vpop.f32.mrf.mxu0 }
 0x325   :  { %v439_v54 = vpop.f32.mrf.mxu0 }

</bundles_post_ra>
